<compile_context>
chip_gen: v6e
topology: v6e:2x2x1
jax: 0.10.0
libtpu: 0.0.40
codegen_flags: <defaults>
</compile_context>

<pallas_src>
import functools

import jax
import jax.numpy as jnp
from jax.experimental import pallas as pl
from jax.experimental.pallas import tpu as pltpu

EPS = 1e-5          # nn.LayerNorm default
_SUBLANE = 8
_MIB = 1024 * 1024


def _round_up(a, b):
    return (a + b - 1) // b * b


def _addnorm_kernel(x_ref, y_ref, gamma_ref, beta_ref, o_ref, *, hidden):
    """o = LayerNorm(y) * gamma + beta + x, normalized over the last axis."""
    y = y_ref[...].astype(jnp.float32)
    x = x_ref[...].astype(jnp.float32)

    inv_h = jnp.float32(1.0 / hidden)
    # Single pass: sum(y) and sum(y*y) are two independent cross-lane (XLU)
    # reductions; var = E[y^2] - mean^2 in f32, clamped against cancellation.
    s1 = jnp.sum(y, axis=-1, keepdims=True)
    s2 = jnp.sum(y * y, axis=-1, keepdims=True)
    mean = s1 * inv_h
    var = jnp.maximum(s2 * inv_h - mean * mean, 0.0)
    inv_std = jax.lax.rsqrt(var + EPS)          # EUP transcendental

    out = (y - mean) * inv_std * gamma_ref[...] + beta_ref[...] + x
    o_ref[...] = out.astype(o_ref.dtype)


def add_norm(x, y, gamma, beta, *, tile_rows=None):
    """LayerNorm(y) over the last axis, plus x.  x, y: (..., H); gamma, beta: (H,)."""
    assert x.shape == y.shape
    orig_shape = x.shape
    H = orig_shape[-1]
    rows = 1
    for d in orig_shape[:-1]:
        rows *= d

    itemsize = jnp.dtype(x.dtype).itemsize

    # Physical VMEM per TensorCore (v7x: 64 MiB, v5e/v6e: 128 MiB).
    try:
        phys_vmem = int(pltpu.get_tpu_info().vmem_capacity_bytes)
    except Exception:
        phys_vmem = 64 * _MIB          # conservative fallback (v7x)

    # Per-tile-row VMEM estimate: double-buffered X/Y/O tiles in the input
    # dtype + the f32 intermediates (x, y, out) the kernel materializes.
    per_row = 2 * 3 * H * itemsize + 3 * H * 4
    budget = min(phys_vmem * 5 // 8, 64 * _MIB)

    if tile_rows is None:
        tile_rows = (budget // per_row) // _SUBLANE * _SUBLANE
    tile_rows = max(_SUBLANE, int(tile_rows))

    if rows <= _SUBLANE:
        # Tiny inputs: one block covering the whole (rows, H) array
        # (block dim == full array dim is always legal).
        tile_rows = rows
        num_steps = 1
    else:
        tile_rows = min(tile_rows, _round_up(rows, _SUBLANE))
        tile_rows = max(_SUBLANE, tile_rows // _SUBLANE * _SUBLANE)
        num_steps = (rows + tile_rows - 1) // tile_rows
        # Even step count -> balanced split across v7x's two TensorCores
        # (no effect on single-TC v5e/v6e).
        if num_steps > 1 and num_steps % 2 == 1:
            target = num_steps + 1
            tile_rows = max(_SUBLANE,
                            _round_up((rows + target - 1) // target, _SUBLANE))
            num_steps = (rows + tile_rows - 1) // tile_rows

    # Scoped-VMEM limit sized to the chosen tiles (+ slack), capped to physical.
    vmem_limit = int(min(phys_vmem,
                         max(16 * _MIB, tile_rows * per_row + 8 * _MIB)))

    # Flat (rows, H) views — contiguous reshapes, no HBM copies.
    x2 = x.reshape(rows, H)
    y2 = y.reshape(rows, H)
    g2 = gamma.astype(jnp.float32).reshape(1, H)
    b2 = beta.astype(jnp.float32).reshape(1, H)

    out = pl.pallas_call(
        functools.partial(_addnorm_kernel, hidden=H),
        out_shape=jax.ShapeDtypeStruct((rows, H), x.dtype),
        grid_spec=pltpu.PrefetchScalarGridSpec(
            num_scalar_prefetch=0,
            grid=(num_steps,),
            in_specs=[
                pl.BlockSpec((tile_rows, H), lambda i: (i, 0)),  # X
                pl.BlockSpec((tile_rows, H), lambda i: (i, 0)),  # Y
                pl.BlockSpec((1, H), lambda i: (0, 0)),          # gamma (f32)
                pl.BlockSpec((1, H), lambda i: (0, 0)),          # beta  (f32)
            ],
            out_specs=pl.BlockSpec((tile_rows, H), lambda i: (i, 0)),
        ),
        compiler_params=pltpu.CompilerParams(
            dimension_semantics=("parallel",),
            vmem_limit_bytes=vmem_limit,
        ),
    )(x2, y2, g2, b2)

    return out.reshape(orig_shape)


if __name__ == "__main__":
    # Small shapes consistent with the module's forward: (batch, seq, hidden)
    B, S, H = 2, 8, 32
    key = jax.random.PRNGKey(0)
    kx, ky = jax.random.split(key)
    X = jax.random.normal(kx, (B, S, H), dtype=jnp.float32)
    Y = jax.random.normal(ky, (B, S, H), dtype=jnp.float32)

    # nn.LayerNorm default parameter init: weight = 1, bias = 0
    gamma = jnp.ones((H,), dtype=jnp.float32)
    beta = jnp.zeros((H,), dtype=jnp.float32)

    out = jax.block_until_ready(add_norm(X, Y, gamma, beta))

    # Reference check in plain JAX.
    mean = jnp.mean(Y, axis=-1, keepdims=True)
    var = jnp.mean((Y - mean) ** 2, axis=-1, keepdims=True)
    ref = (Y - mean) / jnp.sqrt(var + EPS) * gamma + beta + X
    assert jnp.allclose(out, ref, atol=1e-5, rtol=1e-5), "mismatch vs reference"

    print("KERNEL_OK")
</pallas_src>

<mosaic_0001>
module attributes {stable_mosaic.version = 11 : i64} {
  func.func @_addnorm_kernel(%arg0: i32, %arg1: memref<16x32xf32, #tpu.memory_space<vmem>>, %arg2: memref<16x32xf32, #tpu.memory_space<vmem>>, %arg3: memref<1x32xf32, #tpu.memory_space<vmem>>, %arg4: memref<1x32xf32, #tpu.memory_space<vmem>>, %arg5: memref<16x32xf32, #tpu.memory_space<vmem>>) attributes {dimension_semantics = [#tpu.dimension_semantics<parallel>], iteration_bounds = array<i64: 1>, scalar_prefetch = 0 : i64, scratch_operands = 0 : i64, tpu.core_type = #tpu.core_type<tc>, window_params = [{transform_indices = @transform_0, window_bounds = array<i64: 16, 32>}, {transform_indices = @transform_1, window_bounds = array<i64: 16, 32>}, {pipeline_mode = #tpu.pipeline_mode<synchronous>, transform_indices = @transform_2, window_bounds = array<i64: 1, 32>}, {pipeline_mode = #tpu.pipeline_mode<synchronous>, transform_indices = @transform_3, window_bounds = array<i64: 1, 32>}, {transform_indices = @transform_4, window_bounds = array<i64: 16, 32>}]} {
    %c0 = arith.constant 0 : index
    %c0_0 = arith.constant 0 : index
    %0 = vector.load %arg2[%c0, %c0_0] : memref<16x32xf32, #tpu.memory_space<vmem>>, vector<16x32xf32>
    %c0_1 = arith.constant 0 : index
    %c0_2 = arith.constant 0 : index
    %1 = vector.load %arg1[%c0_1, %c0_2] : memref<16x32xf32, #tpu.memory_space<vmem>>, vector<16x32xf32>
    %cst = arith.constant dense<0.000000e+00> : vector<16xf32>
    %2 = vector.multi_reduction <add>, %0, %cst [1] : vector<16x32xf32> to vector<16xf32>
    %3 = vector.shape_cast %2 : vector<16xf32> to vector<16x1xf32>
    %4 = arith.mulf %0, %0 : vector<16x32xf32>
    %cst_3 = arith.constant dense<0.000000e+00> : vector<16xf32>
    %5 = vector.multi_reduction <add>, %4, %cst_3 [1] : vector<16x32xf32> to vector<16xf32>
    %6 = vector.shape_cast %5 : vector<16xf32> to vector<16x1xf32>
    %cst_4 = arith.constant 3.125000e-02 : f32
    %7 = vector.broadcast %cst_4 : f32 to vector<16x1xf32>
    %8 = arith.mulf %3, %7 : vector<16x1xf32>
    %cst_5 = arith.constant 3.125000e-02 : f32
    %9 = vector.broadcast %cst_5 : f32 to vector<16x1xf32>
    %10 = arith.mulf %6, %9 : vector<16x1xf32>
    %11 = arith.mulf %8, %8 : vector<16x1xf32>
    %12 = arith.subf %10, %11 : vector<16x1xf32>
    %cst_6 = arith.constant 0.000000e+00 : f32
    %13 = vector.broadcast %cst_6 : f32 to vector<16x1xf32>
    %14 = arith.maximumf %12, %13 : vector<16x1xf32>
    %cst_7 = arith.constant 9.99999974E-6 : f32
    %15 = vector.broadcast %cst_7 : f32 to vector<16x1xf32>
    %16 = arith.addf %14, %15 : vector<16x1xf32>
    %17 = math.rsqrt %16 : vector<16x1xf32>
    %18 = vector.broadcast %8 : vector<16x1xf32> to vector<16x32xf32>
    %19 = arith.subf %0, %18 : vector<16x32xf32>
    %20 = vector.broadcast %17 : vector<16x1xf32> to vector<16x32xf32>
    %21 = arith.mulf %19, %20 : vector<16x32xf32>
    %c0_8 = arith.constant 0 : index
    %c0_9 = arith.constant 0 : index
    %22 = vector.load %arg3[%c0_8, %c0_9] : memref<1x32xf32, #tpu.memory_space<vmem>>, vector<1x32xf32>
    %23 = vector.broadcast %22 : vector<1x32xf32> to vector<16x32xf32>
    %24 = arith.mulf %21, %23 : vector<16x32xf32>
    %c0_10 = arith.constant 0 : index
    %c0_11 = arith.constant 0 : index
    %25 = vector.load %arg4[%c0_10, %c0_11] : memref<1x32xf32, #tpu.memory_space<vmem>>, vector<1x32xf32>
    %26 = vector.broadcast %25 : vector<1x32xf32> to vector<16x32xf32>
    %27 = arith.addf %24, %26 : vector<16x32xf32>
    %28 = arith.addf %27, %1 : vector<16x32xf32>
    %c0_12 = arith.constant 0 : index
    %c0_13 = arith.constant 0 : index
    %29 = vector.load %arg5[%c0_12, %c0_13] : memref<16x32xf32, #tpu.memory_space<vmem>>, vector<16x32xf32>
    tpu.vector_store %arg5[%c0_12, %c0_13], %28 {strides = array<i32>} : memref<16x32xf32, #tpu.memory_space<vmem>>, vector<16x32xf32>,
    return
  }
  func.func @transform_0(%arg0: i32) -> (i32, i32) {
    %c0_i32 = arith.constant 0 : i32
    %c0_i32_0 = arith.constant 0 : i32
    return %arg0, %c0_i32 : i32, i32
  }
  func.func @transform_1(%arg0: i32) -> (i32, i32) {
    %c0_i32 = arith.constant 0 : i32
    %c0_i32_0 = arith.constant 0 : i32
    return %arg0, %c0_i32 : i32, i32
  }
  func.func @transform_2(%arg0: i32) -> (i32, i32) {
    %c0_i32 = arith.constant 0 : i32
    %c0_i32_0 = arith.constant 0 : i32
    %c0_i32_1 = arith.constant 0 : i32
    return %c0_i32, %c0_i32_0 : i32, i32
  }
  func.func @transform_3(%arg0: i32) -> (i32, i32) {
    %c0_i32 = arith.constant 0 : i32
    %c0_i32_0 = arith.constant 0 : i32
    %c0_i32_1 = arith.constant 0 : i32
    return %c0_i32, %c0_i32_0 : i32, i32
  }
  func.func @transform_4(%arg0: i32) -> (i32, i32) {
    %c0_i32 = arith.constant 0 : i32
    %c0_i32_0 = arith.constant 0 : i32
    return %arg0, %c0_i32 : i32, i32
  }
}

</mosaic_0001>

<bundles_post_ra>
// kernel: tpu_custom_call.1
= control target key start
LH: loop header
LB: loop body
LE: loop exit
PB: predicated region body
PF: predicated region fallthrough
CT: control target
= control target key end

     0   :  { %9 = vsyncpa [#allocation3], 0  ;;  %s260_s0 = inlined_call_operand.hbm [shape: f32[16,32], index: 0, kind: input, shape index: {}]   ;;  %s261_s1 = inlined_call_operand.hbm [shape: f32[16,32], index: 1, kind: input, shape index: {}]   ;;  %s262_s2 = inlined_call_operand.vmem [shape: f32[1,32], index: 2, kind: input, shape index: {}]   ;;  %s263_s3 = inlined_call_operand.vmem [shape: f32[1,32], index: 3, kind: input, shape index: {}]   ;;  %s264_s4 = inlined_call_operand.hbm [shape: f32[16,32], index: 4, kind: output, shape index: {}]  }
   0x1   :  { %10 = vsyncpa [#allocation6], 0 }
   0x2   :  { %11 = vsyncpa [#allocation4], 0  ;;  %s200_s15 = smov [#allocation2]  }
   0x3   :  { %s17_s16 = sshll.u32 %s200_s15, 4  ;;  %s18_s16 = int_to_ptr.vmem [resolvable:$true] %s17_s16 }
   0x4   :  { %s142_s17 = scalar_lea.vmem %s18_s16, 256  ;;  %p147_p1 = scmp.lt.s32.totalorder %s18_s16, %s18_s16 }
   0x5   :  { %p143_p0 = scmp.ne.s32.totalorder %s18_s16, %s142_s17  ;;  %p148_p2 = scmp.lt.s32.totalorder %s142_s17, %s142_s17 }
   0x7   :  { %p149_p3 = por %p148_p2, %p147_p1 }
   0x9   :  { %p150_p4 = pnand %p149_p3, %p143_p0 }
   0xb   :  { %153 = shalt.err (!%p150_p4)
}
   0xc   :  { %s201_s18 = smov 128   ;;  %s202_s19 = smov 8  }
   0xd   :  { %23 = dma.hbm_to_vmem [thread:$0]  %s260_s0, 256, %s18_s16, [#allocation3], %s201_s18, %s201_s18, %s202_s19  }
   0xe   :  { %s203_s22 = smov [#allocation5]  }
   0xf   :  { %s29_s23 = sshll.u32 %s203_s22, 4  ;;  %s30_s23 = int_to_ptr.vmem [resolvable:$true] %s29_s23 }
  0x10   :  { %s162_s24 = scalar_lea.vmem %s30_s23, 256  ;;  %p167_p6 = scmp.lt.s32.totalorder %s30_s23, %s30_s23 }
  0x11   :  { %p163_p5 = scmp.ne.s32.totalorder %s30_s23, %s162_s24  ;;  %p168_p7 = scmp.lt.s32.totalorder %s162_s24, %s162_s24 }
  0x13   :  { %p169_p8 = por %p168_p7, %p167_p6 }
  0x15   :  { %p170_p9 = pnand %p169_p8, %p163_p5 }
  0x17   :  { %173 = shalt.err (!%p170_p9)
}
  0x18   :  { %35 = dma.hbm_to_vmem [thread:$0]  %s261_s1, 256, %s30_s23, [#allocation6], %s201_s18, %s201_s18, %s202_s19  }
  0x19   :  { %194 = dma.done.wait [#allocation3], 256  }
  0x1a   :  { %195 = vsyncadd [#allocation3], 4294967040 }
  0x1b   :  { %196 = dma.done.wait [#allocation6], 256  }
  0x1c   :  { %197 = vsyncadd [#allocation6], 4294967040  ;;  %vm50_vm0 = vcmask 261120   ;;  %v46_v0 = vld [vmem:[#allocation5] sm:$0xff]  ;;  %v47_v1 = vld [vmem:[#allocation5 + $0x8] sm:$0xff]  ;;  %s204_s29 = smov [#allocation7]  }
  0x1d   :  { %v51_v2 = vsel %vm50_vm0, %v46_v0, 0.0  ;;  %v57_v3 = vmul.f32 %v46_v0, %v46_v0  ;;  %v58_v4 = vmul.f32 %v47_v1, %v47_v1  ;;  %v54_v6 = vsel %vm50_vm0, %v47_v1, 0.0  ;;  %v123_v26 = vld [vmem:[%s262_s2] ss:$0 sm:$0xff]  ;;  %v49_v37 = vld [vmem:[#allocation2 + $0x8] sm:$0xff]  ;;  %s110_s30 = sshll.u32 %s204_s29, 4  ;;  %s111_s30 = int_to_ptr.vmem [resolvable:$true] %s110_s30 }
  0x1e   :  { %52 = vadd.xlane.f32.xlu0 %v51_v2  ;;  %v124_v28 = vld [vmem:[%s263_s3] ss:$0 sm:$0xff]  ;;  %s174_s2 = scalar_lea.vmem %s111_s30, 256  ;;  %p179_p11 = scmp.lt.s32.totalorder %s111_s30, %s111_s30 }
  0x1f   :  { %v59_v5 = vsel %vm50_vm0, %v57_v3, 0.0  ;;  %v62_v7 = vsel %vm50_vm0, %v58_v4, 0.0  ;;  %v48_v32 = vld [vmem:[#allocation2] sm:$0xff]  ;;  %p175_p10 = scmp.ne.s32.totalorder %s111_s30, %s174_s2  ;;  %p180_p12 = scmp.lt.s32.totalorder %s174_s2, %s174_s2 }
  0x20   :  { %60 = vadd.xlane.f32.xlu1 %v59_v5 }
  0x21   :  { %p181_p13 = por %p180_p12, %p179_p11 }
  0x22   :  { %55 = vadd.xlane.f32.xlu0 %v54_v6 }
  0x23   :  { %p182_p0 = pnand %p181_p13, %p175_p10 }
  0x24   :  { %63 = vadd.xlane.f32.xlu1 %v62_v7 }
  0xa7   :  { %v53_v8 = vpop.xlane.xlu0 %52 }
  0xa8   :  { %v65_v9 = vmul.f32 0.03125, %v53_v8 }
  0xa9   :  { %v61_v10 = vpop.xlane.xlu1 %60 }
  0xaa   :  { %v69_v11 = vmul.f32 %v65_v9, %v65_v9  ;;  %v67_v12 = vmul.f32 0.03125, %v61_v10  ;;  %v79_v24 = vsub.f32 %v46_v0, %v65_v9 }
  0xab   :  { %v56_v13 = vpop.xlane.xlu0 %55 }
  0xac   :  { %v71_v14 = vsub.f32 %v67_v12, %v69_v11  ;;  %v66_v15 = vmul.f32 0.03125, %v56_v13 }
  0xad   :  { %v64_v16 = vpop.xlane.xlu1 %63 }
  0xae   :  { %v73_v17 = vmax.f32 %v71_v14, 0.0  ;;  %v70_v18 = vmul.f32 %v66_v15, %v66_v15  ;;  %v68_v19 = vmul.f32 0.03125, %v64_v16  ;;  %v80_v29 = vsub.f32 %v47_v1, %v66_v15 }
  0xb0   :  { %v75_v20 = vadd.f32 1e-05, %v73_v17  ;;  %v72_v21 = vsub.f32 %v68_v19, %v70_v18 }
  0xb2   :  { %130 = vrsqrt.f32 %v75_v20  ;;  %v74_v22 = vmax.f32 %v72_v21, 0.0 }
  0xb4   :  { %v76_v23 = vadd.f32 1e-05, %v74_v22 }
  0xb6   :  { %132 = vrsqrt.f32 %v76_v23 }
  0xbf   :  { %v131_v25 = vpop.eup %130 }
  0xc0   :  { %v81_v27 = vmul.f32 %v131_v25, %v79_v24 }
  0xc2   :  { %v90_v30 = vmul.f32 %v123_v26, %v81_v27 }
  0xc3   :  { %v133_v31 = vpop.eup %132 }
  0xc4   :  { %v82_v33 = vmul.f32 %v133_v31, %v80_v29  ;;  %v99_v34 = vadd.f32 %v124_v28, %v90_v30 }
  0xc6   :  { %v91_v35 = vmul.f32 %v123_v26, %v82_v33  ;;  %v101_v36 = vadd.f32 %v99_v34, %v48_v32 }
  0xc8   :  { %v100_v38 = vadd.f32 %v124_v28, %v91_v35  ;;  %103 = vst.msk [vmem:[#allocation7] sm:$0xff] %vm50_vm0, %v101_v36 }
  0xca   :  { %v102_v39 = vadd.f32 %v100_v38, %v49_v37 }
  0xcc   :  { %104 = vst.msk [vmem:[#allocation7 + $0x8] sm:$0xff] %vm50_vm0, %v102_v39 }
  0xcd   :  { %185 = shalt.err (!%p182_p0)
}
  0xce   :  { %116 = dma.vmem_to_hbm [thread:$0]  %s111_s30, 256, %s264_s4, [#allocation4], %s201_s18, %s201_s18, %s202_s19  }
  0xcf   :  { %198 = dma.done.wait [#allocation4], 256  }
  0xd0   :  { %199 = vsyncadd [#allocation4], 4294967040 }
  0xd1   :  { %120 = vsyncpa [#allocation3], 1 }
  0xd2   :  { %121 = vsyncpa [#allocation6], 1 }
  0xd3   :  { %122 = vsyncpa [#allocation4], 1 }

</bundles_post_ra>
